<compile_context>
chip_gen: v7x
topology: tpu7x:2x2x1
jax: 0.10.0
libtpu: 0.0.40
codegen_flags: <defaults>
</compile_context>

<pallas_src>
import jax
import jax.numpy as jnp
from jax import lax
from jax.experimental import pallas as pl
from jax.experimental.pallas import tpu as pltpu

LANES = 128          # lane width (last dim of the slab)
NUM_CORES = 2        # leading grid axis (both v7x TCs; serial no-op elsewhere)


def _round_up(x, m):
    return (x + m - 1) // m * m


def _device_kind():
    try:
        return jax.devices()[0].device_kind.lower()
    except Exception:
        return ""


_KIND = _device_kind()
_IS_V7X = ("v7" in _KIND) or ("7x" in _KIND)
_IS_NEW_GEN = _IS_V7X or ("v6" in _KIND)

# Per-input block bytes: 3 inputs x 2 pipeline buffers must fit the default
# scoped-VMEM budget (16 MiB on v5e/older, 32 MiB on v6e/v7x) with headroom.
_PER_INPUT_BLOCK_BYTES = (4 if _IS_NEW_GEN else 2) * 1024 * 1024


def _sublane_packing(dtype):
    # rows per (sublane) tile: 8 for 4-byte, 16 for 2-byte, 32 for 1-byte.
    return 8 * max(1, 4 // jnp.dtype(dtype).itemsize)


def _make_kernel(tm, rows, num_blocks):
    """Kernel closure over static tile height / slab geometry."""
    has_partial = (rows % tm) != 0
    full_blocks = num_blocks - 1 if has_partial else num_blocks
    tail_valid = rows - (num_blocks - 1) * tm   # valid rows in the last block

    def kernel(pre_ref, label_ref, mask_ref, sq_ref, n_ref):
        c = pl.program_id(0)          # core slot
        i = pl.program_id(1)          # block step within this core

        @pl.when(i == 0)
        def _():
            sq_ref[...] = jnp.zeros_like(sq_ref)
            n_ref[...] = jnp.zeros_like(n_ref)

        gb = c * pl.num_programs(1) + i   # global block index

        def accumulate(sq, mm):
            # VPU-only partial reduction into resident (8,128) accumulators.
            # Output block index depends only on `c`, so it stays resident
            # across the inner grid axis and acts as the accumulator.
            sq_ref[0] += jnp.sum(sq.reshape(tm // 8, 8, LANES), axis=0)
            n_ref[0] += jnp.sum(mm.reshape(tm // 8, 8, LANES), axis=0)

        @pl.when(gb < full_blocks)
        def _fast():
            # Hot path: fully-valid block, no tail masking at all.
            m = mask_ref[...].astype(jnp.float32)
            err = (pre_ref[...].astype(jnp.float32)
                   - label_ref[...].astype(jnp.float32)) * m
            accumulate(err * err, m)

        if has_partial:
            @pl.when(gb == num_blocks - 1)
            def _tail():
                # Only the single partial last block pays for the guard.
                # (tm, 1) predicate broadcast along lanes; keep it a SELECT
                # (not a multiplicative mask): DMA garbage may be NaN/Inf.
                live = (lax.broadcasted_iota(jnp.int32, (tm, 1), 0)
                        < tail_valid)
                m = mask_ref[...].astype(jnp.float32)
                err = (pre_ref[...].astype(jnp.float32)
                       - label_ref[...].astype(jnp.float32)) * m
                accumulate(jnp.where(live, err * err, 0.0),
                           jnp.where(live, m, 0.0))
        # gb >= num_blocks (clamped re-read on the second core): skip compute.

    return kernel


def _to_slab(x, rows, total, padded_total):
    """Flatten to [rows, LANES] in native dtype; pad only if shape demands it."""
    flat = x.reshape(-1)                       # free bitcast
    if padded_total != total:
        flat = jnp.pad(flat, (0, padded_total - total))
    return flat.reshape(rows, LANES)


@jax.jit
def st_loss(pre, label, mask):
    total = pre.size
    itemsizes = [jnp.dtype(a.dtype).itemsize for a in (pre, label, mask)]

    # Round rows to the strictest native sublane packing among the inputs so
    # packed (bf16/int8/bool) slabs never get ragged partial sublane tiles.
    packing = max(_sublane_packing(a.dtype) for a in (pre, label, mask))
    rows = _round_up(pl.cdiv(total, LANES), packing)
    padded_total = rows * LANES

    pre2 = _to_slab(pre, rows, total, padded_total)
    lab2 = _to_slab(label, rows, total, padded_total)
    msk2 = _to_slab(mask, rows, total, padded_total)   # native dtype, no upcast

    # Generation-aware block height; multiple of 32 covers every packing.
    max_itemsize = max(itemsizes)
    tm_cap = max(32, (_PER_INPUT_BLOCK_BYTES // (LANES * max_itemsize))
                 // 32 * 32)
    tm = min(tm_cap, rows)                 # multiple of 8, never exceeds rows

    num_blocks = pl.cdiv(rows, tm)
    half = pl.cdiv(num_blocks, NUM_CORES)  # blocks per core

    def in_map(c, i):
        # Clamp so the (rare) extra step on the second core re-reads an
        # in-bounds block; its contribution is skipped in-kernel.
        return (jnp.minimum(c * half + i, num_blocks - 1), 0)

    tile_spec = pl.BlockSpec((tm, LANES), in_map)
    out_spec = pl.BlockSpec((1, 8, LANES), lambda c, i: (c, 0, 0))

    cost = pl.CostEstimate(
        flops=6 * padded_total,
        transcendentals=0,
        bytes_accessed=padded_total * sum(itemsizes)
        + 2 * NUM_CORES * 8 * LANES * 4,
    )

    if _IS_V7X:
        dim_sem = (pltpu.CORE_PARALLEL, pltpu.ARBITRARY)
    else:
        dim_sem = ("parallel", "arbitrary")

    sq_parts, n_parts = pl.pallas_call(
        _make_kernel(tm, rows, num_blocks),
        out_shape=(
            jax.ShapeDtypeStruct((NUM_CORES, 8, LANES), jnp.float32),
            jax.ShapeDtypeStruct((NUM_CORES, 8, LANES), jnp.float32),
        ),
        grid_spec=pltpu.PrefetchScalarGridSpec(
            num_scalar_prefetch=0,
            grid=(NUM_CORES, half),
            in_specs=[tile_spec, tile_spec, tile_spec],
            out_specs=[out_spec, out_spec],
        ),
        compiler_params=pltpu.CompilerParams(dimension_semantics=dim_sem),
        cost_estimate=cost,
    )(pre2, lab2, msk2)

    sq = jnp.sum(sq_parts)
    n = jnp.sum(n_parts)
    # PyTorch returns 0 when mask.sum() == 0; otherwise squared_sum / n.
    return jnp.where(n != 0, sq / jnp.where(n != 0, n, 1.0), 0.0)


def st_loss_ref(pre, label, mask):
    # Mirrors the PyTorch module's math exactly.
    pre = pre * mask
    label = label * mask
    err = (pre - label).astype(jnp.float32)
    sq = jnp.sum(err ** 2)
    n = jnp.sum(mask.astype(jnp.float32))
    return jnp.where(n != 0, sq / jnp.where(n != 0, n, 1.0), 0.0)


if __name__ == "__main__":
    key = jax.random.PRNGKey(0)
    k1, k2, k3 = jax.random.split(key, 3)

    # 1) Standard NCHW case (copy-free path: 2*4*16*16 = 2048 = 16 rows of 128).
    shape = (2, 4, 16, 16)
    pre = jax.random.normal(k1, shape, dtype=jnp.float32)
    label = jax.random.normal(k2, shape, dtype=jnp.float32)
    mask = (jax.random.uniform(k3, shape) > 0.5).astype(jnp.float32)

    loss = jax.block_until_ready(st_loss(pre, label, mask))
    ref = st_loss_ref(pre, label, mask)
    assert jnp.allclose(loss, ref, rtol=1e-5, atol=1e-5), (loss, ref)

    # 2) All-zero mask branch -> 0.
    zero_mask = jnp.zeros(shape, dtype=jnp.float32)
    loss0 = jax.block_until_ready(st_loss(pre, label, zero_mask))
    assert loss0 == 0.0

    # 3) Non-128-divisible size (exercises the pad path).
    shape2 = (2, 3, 7, 5)
    p2 = jax.random.normal(k1, shape2, dtype=jnp.float32)
    l2 = jax.random.normal(k2, shape2, dtype=jnp.float32)
    m2 = (jax.random.uniform(k3, shape2) > 0.5).astype(jnp.float32)
    loss2 = jax.block_until_ready(st_loss(p2, l2, m2))
    ref2 = st_loss_ref(p2, l2, m2)
    assert jnp.allclose(loss2, ref2, rtol=1e-5, atol=1e-5), (loss2, ref2)

    # 4) bf16 inputs (exercises dtype-packing-aware rounding, in-kernel upcast).
    pre_b = pre.astype(jnp.bfloat16)
    lab_b = label.astype(jnp.bfloat16)
    loss3 = jax.block_until_ready(st_loss(pre_b, lab_b, mask))
    ref3 = st_loss_ref(pre_b, lab_b, mask)
    assert jnp.allclose(loss3, ref3, rtol=1e-3, atol=1e-4), (loss3, ref3)

    # 5) Large ragged input: multiple blocks + in-kernel tail-mask path +
    #    skipped clamped step on the second core.
    big = 1_100_003
    pb = jax.random.normal(k1, (big,), dtype=jnp.float32)
    lb = jax.random.normal(k2, (big,), dtype=jnp.float32)
    mb = (jax.random.uniform(k3, (big,)) > 0.5).astype(jnp.float32)
    loss4 = jax.block_until_ready(st_loss(pb, lb, mb))
    ref4 = st_loss_ref(pb, lb, mb)
    assert jnp.allclose(loss4, ref4, rtol=1e-5, atol=1e-5), (loss4, ref4)

    print("KERNEL_OK")
</pallas_src>

<mosaic_0001>
module attributes {stable_mosaic.version = 11 : i64} {
  func.func @kernel(%arg0: i32, %arg1: i32, %arg2: memref<16x128xf32, #tpu.memory_space<vmem>>, %arg3: memref<16x128xf32, #tpu.memory_space<vmem>>, %arg4: memref<16x128xf32, #tpu.memory_space<vmem>>, %arg5: memref<1x8x128xf32, #tpu.memory_space<vmem>>, %arg6: memref<1x8x128xf32, #tpu.memory_space<vmem>>) attributes {dimension_semantics = [#tpu.dimension_semantics<parallel>, #tpu.dimension_semantics<arbitrary>], iteration_bounds = array<i64: 2, 1>, scalar_prefetch = 0 : i64, scratch_operands = 0 : i64, tpu.core_type = #tpu.core_type<tc>, window_params = [{transform_indices = @transform_0, window_bounds = array<i64: 16, 128>}, {transform_indices = @transform_1, window_bounds = array<i64: 16, 128>}, {transform_indices = @transform_2, window_bounds = array<i64: 16, 128>}, {transform_indices = @transform_3, window_bounds = array<i64: 1, 8, 128>}, {transform_indices = @transform_4, window_bounds = array<i64: 1, 8, 128>}]} {
    %c0_i32 = arith.constant 0 : i32
    %0 = arith.cmpi eq, %arg1, %c0_i32 : i32
    %1 = arith.extui %0 : i1 to i32
    %c0_i32_0 = arith.constant 0 : i32
    %2 = arith.cmpi ne, %1, %c0_i32_0 : i32
    scf.if %2 {
      %cst = arith.constant 0.000000e+00 : f32
      %8 = vector.broadcast %cst : f32 to vector<1x8x128xf32>
      %c0 = arith.constant 0 : index
      %c0_3 = arith.constant 0 : index
      %c0_4 = arith.constant 0 : index
      %9 = vector.load %arg5[%c0, %c0_3, %c0_4] : memref<1x8x128xf32, #tpu.memory_space<vmem>>, vector<1x8x128xf32>
      tpu.vector_store %arg5[%c0, %c0_3, %c0_4], %8 {strides = array<i32>} : memref<1x8x128xf32, #tpu.memory_space<vmem>>, vector<1x8x128xf32>,
      %cst_5 = arith.constant 0.000000e+00 : f32
      %10 = vector.broadcast %cst_5 : f32 to vector<1x8x128xf32>
      %c0_6 = arith.constant 0 : index
      %c0_7 = arith.constant 0 : index
      %c0_8 = arith.constant 0 : index
      %11 = vector.load %arg6[%c0_6, %c0_7, %c0_8] : memref<1x8x128xf32, #tpu.memory_space<vmem>>, vector<1x8x128xf32>
      tpu.vector_store %arg6[%c0_6, %c0_7, %c0_8], %10 {strides = array<i32>} : memref<1x8x128xf32, #tpu.memory_space<vmem>>, vector<1x8x128xf32>,
    } else {
    }
    %c1_i32 = arith.constant 1 : i32
    %3 = arith.muli %arg0, %c1_i32 : i32
    %4 = arith.addi %3, %arg1 : i32
    %c1_i32_1 = arith.constant 1 : i32
    %5 = arith.cmpi slt, %4, %c1_i32_1 : i32
    %6 = arith.extui %5 : i1 to i32
    %c0_i32_2 = arith.constant 0 : i32
    %7 = arith.cmpi ne, %6, %c0_i32_2 : i32
    scf.if %7 {
      %c0 = arith.constant 0 : index
      %c0_3 = arith.constant 0 : index
      %8 = vector.load %arg4[%c0, %c0_3] : memref<16x128xf32, #tpu.memory_space<vmem>>, vector<16x128xf32>
      %c0_4 = arith.constant 0 : index
      %c0_5 = arith.constant 0 : index
      %9 = vector.load %arg2[%c0_4, %c0_5] : memref<16x128xf32, #tpu.memory_space<vmem>>, vector<16x128xf32>
      %c0_6 = arith.constant 0 : index
      %c0_7 = arith.constant 0 : index
      %10 = vector.load %arg3[%c0_6, %c0_7] : memref<16x128xf32, #tpu.memory_space<vmem>>, vector<16x128xf32>
      %11 = arith.subf %9, %10 : vector<16x128xf32>
      %12 = arith.mulf %11, %8 : vector<16x128xf32>
      %13 = arith.mulf %12, %12 : vector<16x128xf32>
      %c0_8 = arith.constant 0 : index
      %c0_9 = arith.constant 0 : index
      %c0_10 = arith.constant 0 : index
      %14 = vector.load %arg5[%c0_8, %c0_9, %c0_10] : memref<1x8x128xf32, #tpu.memory_space<vmem>>, vector<1x8x128xf32>
      %15 = vector.shape_cast %14 : vector<1x8x128xf32> to vector<8x128xf32>
      %16 = vector.shape_cast %13 : vector<16x128xf32> to vector<2x8x128xf32>
      %cst = arith.constant dense<0.000000e+00> : vector<8x128xf32>
      %17 = vector.multi_reduction <add>, %16, %cst [0] : vector<2x8x128xf32> to vector<8x128xf32>
      %18 = arith.addf %15, %17 : vector<8x128xf32>
      %c0_11 = arith.constant 0 : index
      %c0_12 = arith.constant 0 : index
      %c0_13 = arith.constant 0 : index
      %19 = vector.load %arg5[%c0_11, %c0_12, %c0_13] : memref<1x8x128xf32, #tpu.memory_space<vmem>>, vector<1x8x128xf32>
      %20 = vector.shape_cast %19 : vector<1x8x128xf32> to vector<8x128xf32>
      %21 = vector.shape_cast %18 : vector<8x128xf32> to vector<1x8x128xf32>
      tpu.vector_store %arg5[%c0_11, %c0_12, %c0_13], %21 {strides = array<i32>} : memref<1x8x128xf32, #tpu.memory_space<vmem>>, vector<1x8x128xf32>,
      %c0_14 = arith.constant 0 : index
      %c0_15 = arith.constant 0 : index
      %c0_16 = arith.constant 0 : index
      %22 = vector.load %arg6[%c0_14, %c0_15, %c0_16] : memref<1x8x128xf32, #tpu.memory_space<vmem>>, vector<1x8x128xf32>
      %23 = vector.shape_cast %22 : vector<1x8x128xf32> to vector<8x128xf32>
      %24 = vector.shape_cast %8 : vector<16x128xf32> to vector<2x8x128xf32>
      %cst_17 = arith.constant dense<0.000000e+00> : vector<8x128xf32>
      %25 = vector.multi_reduction <add>, %24, %cst_17 [0] : vector<2x8x128xf32> to vector<8x128xf32>
      %26 = arith.addf %23, %25 : vector<8x128xf32>
      %c0_18 = arith.constant 0 : index
      %c0_19 = arith.constant 0 : index
      %c0_20 = arith.constant 0 : index
      %27 = vector.load %arg6[%c0_18, %c0_19, %c0_20] : memref<1x8x128xf32, #tpu.memory_space<vmem>>, vector<1x8x128xf32>
      %28 = vector.shape_cast %27 : vector<1x8x128xf32> to vector<8x128xf32>
      %29 = vector.shape_cast %26 : vector<8x128xf32> to vector<1x8x128xf32>
      tpu.vector_store %arg6[%c0_18, %c0_19, %c0_20], %29 {strides = array<i32>} : memref<1x8x128xf32, #tpu.memory_space<vmem>>, vector<1x8x128xf32>,
    } else {
    }
    return
  }
  func.func @transform_0(%arg0: i32, %arg1: i32) -> (i32, i32) {
    %c1_i32 = arith.constant 1 : i32
    %0 = arith.muli %arg0, %c1_i32 : i32
    %1 = arith.addi %0, %arg1 : i32
    %c0_i32 = arith.constant 0 : i32
    %2 = arith.minsi %1, %c0_i32 : i32
    %c0_i32_0 = arith.constant 0 : i32
    %c0_i32_1 = arith.constant 0 : i32
    return %2, %c0_i32_0 : i32, i32
  }
  func.func @transform_1(%arg0: i32, %arg1: i32) -> (i32, i32) {
    %c1_i32 = arith.constant 1 : i32
    %0 = arith.muli %arg0, %c1_i32 : i32
    %1 = arith.addi %0, %arg1 : i32
    %c0_i32 = arith.constant 0 : i32
    %2 = arith.minsi %1, %c0_i32 : i32
    %c0_i32_0 = arith.constant 0 : i32
    %c0_i32_1 = arith.constant 0 : i32
    return %2, %c0_i32_0 : i32, i32
  }
  func.func @transform_2(%arg0: i32, %arg1: i32) -> (i32, i32) {
    %c1_i32 = arith.constant 1 : i32
    %0 = arith.muli %arg0, %c1_i32 : i32
    %1 = arith.addi %0, %arg1 : i32
    %c0_i32 = arith.constant 0 : i32
    %2 = arith.minsi %1, %c0_i32 : i32
    %c0_i32_0 = arith.constant 0 : i32
    %c0_i32_1 = arith.constant 0 : i32
    return %2, %c0_i32_0 : i32, i32
  }
  func.func @transform_3(%arg0: i32, %arg1: i32) -> (i32, i32, i32) {
    %c0_i32 = arith.constant 0 : i32
    %c0_i32_0 = arith.constant 0 : i32
    %c0_i32_1 = arith.constant 0 : i32
    return %arg0, %c0_i32, %c0_i32_0 : i32, i32, i32
  }
  func.func @transform_4(%arg0: i32, %arg1: i32) -> (i32, i32, i32) {
    %c0_i32 = arith.constant 0 : i32
    %c0_i32_0 = arith.constant 0 : i32
    %c0_i32_1 = arith.constant 0 : i32
    return %arg0, %c0_i32, %c0_i32_0 : i32, i32, i32
  }
}

</mosaic_0001>

<bundles_post_ra>
// kernel: st_loss.1
= control target key start
LH: loop header
LB: loop body
LE: loop exit
PB: predicated region body
PF: predicated region fallthrough
CT: control target
= control target key end

     0   :  { %s566_s15 = smov 0   ;;  %s568_s16 = smov 0   ;;  %s613_s0 = inlined_call_operand.vmem [shape: f32[16,128], index: 0, kind: input, shape index: {}]   ;;  %s614_s1 = inlined_call_operand.vmem [shape: f32[16,128], index: 1, kind: input, shape index: {}]   ;;  %s615_s2 = inlined_call_operand.vmem [shape: f32[16,128], index: 2, kind: input, shape index: {}]   ;;  %s616_s3 = inlined_call_operand.vmem [shape: f32[2,8,128], index: 3, kind: output, shape index: {0}]   ;;  %s617_s4 = inlined_call_operand.vmem [shape: f32[2,8,128], index: 4, kind: output, shape index: {1}]  }
   0x1   :  { %s570_s17 = smov 0  }
   0x2 LB: > { %s27_s18 = sadd.s32 1, %s534_s16  ;;  %p479_p0 = scmp.ge.s32.totalorder %s538_s17, 1  ;;  %s538_s17 = sphi %s570_s17, %s15_s17   ;;  %s534_s16 = sphi %s568_s16, %s619_s16   ;;  %s530_s15 = sphi %s566_s15, %s618_s15  }
   0x3   : > { %p29_p1 = scmp.ge.s32.totalorder %s27_s18, 2  ;;  %p236_p2 = scmp.lt.s32.totalorder %s538_s17, 3 }
   0x5   : > { %s621_s18 = smov (%p29_p1, %s27_s18), 0  ;;  %p237_p3 = pnand %p479_p0, %p236_p2 }
   0x6   : > { %p285_p4 = scmp.lt.s32.totalorder (!%p237_p3), %s530_s15, 0  ;;  %p320_p5 = scmp.lt.s32.totalorder (!%p237_p3), %s530_s15, 1  ;;  %v540_v0 = vmov (!%p237_p3), 0.0  }
   0x7   : > { %240 = sbr.rel (%p237_p3) target bundleno = 36 (0x24), region = 32  ;;  %p488_p7 = scmp.ge.s32.totalorder (!%p237_p3), %s530_s15, 1 }
   0xe   : > { %s286_s19 = scalar_select %p285_p4, %s530_s15, 0 }
   0xf   : > { %s321_s20 = scalar_select %p320_p5, %s530_s15, 1 }
  0x10   : > { %s480_s21 = sshll.u32 %s286_s19, 1  ;;  %338 = sbr.rel (%p488_p7) target bundleno = 36 (0x24), region = 40 }
  0x11   : > { %p288_p6 = scmp.lt.s32.totalorder %s480_s21, 1  ;;  %s486_s22 = sshll.u32 %s321_s20, 3 }
  0x12   : > { %s587_s25 = scalar_lea.vmem %s616_s3, %s486_s22  ;;  %s327_s28 = scalar_lea.vmem %s617_s4, %s486_s22 }
  0x13   : > { %s623_s21 = smov (!%p288_p6, %s480_s21), 1  ;;  %332 = vst [vmem:[%s587_s25] sm:$0xff] %v540_v0  ;;  %333 = vst [vmem:[%s327_s28] sm:$0xff] %v540_v0 }
  0x14   : > { %s481_s29 = sshll.u32 %s623_s21, 3 }
  0x15   : > { %s291_s6 = scalar_lea.vmem %s613_s0, %s481_s29  ;;  %s303_s9 = scalar_lea.vmem %s614_s1, %s481_s29 }
  0x16   : > { %s315_s12 = scalar_lea.vmem %s615_s2, %s481_s29  ;;  %v341_v3 = vld [vmem:[%s291_s6] sm:$0xff] (!%p488_p7)  ;;  %v342_v4 = vld [vmem:[%s291_s6 + $0x8] sm:$0xff] (!%p488_p7) }
  0x17   : > { %v339_v1 = vld [vmem:[%s315_s12] sm:$0xff]  ;;  %v340_v2 = vld [vmem:[%s315_s12 + $0x8] sm:$0xff] }
  0x18   : > { %v343_v5 = vld [vmem:[%s303_s9] sm:$0xff]  ;;  %v344_v6 = vld [vmem:[%s303_s9 + $0x8] sm:$0xff]  ;;  %v356_v7 = vadd.f32 %v340_v2, %v339_v1 }
  0x19   : > { %v345_v8 = vsub.f32 %v341_v3, %v343_v5  ;;  %v346_v9 = vsub.f32 %v342_v4, %v344_v6 }
  0x1a   : > { %v355_v10 = vld [vmem:[%s327_s28] sm:$0xff] }
  0x1b   : > { %v357_v11 = vadd.f32 %v356_v7, %v355_v10  ;;  %v347_v12 = vmul.f32 %v345_v8, %v339_v1  ;;  %v348_v13 = vmul.f32 %v346_v9, %v340_v2  ;;  %v351_v16 = vld [vmem:[%s587_s25] sm:$0xff] }
  0x1d   : > { %358 = vst [vmem:[%s327_s28] sm:$0xff] %v357_v11  ;;  %v349_v14 = vmul.f32 %v347_v12, %v347_v12  ;;  %v350_v15 = vmul.f32 %v348_v13, %v348_v13 }
  0x1f   : > { %v352_v17 = vadd.f32 %v350_v15, %v349_v14 }
  0x21   : > { %v353_v18 = vadd.f32 %v352_v17, %v351_v16 }
  0x23   : > { %354 = vst [vmem:[%s587_s25] sm:$0xff] %v353_v18 }
  0x24 PF: > { %s15_s17 = sadd.s32 1, %s538_s17   ;;  %s618_s15 = smov %s534_s16 }
  0x25   : > { %p12_p8 = scmp.ge.s32.totalorder %s15_s17, 4   ;;  %s619_s16 = smov %s621_s18 }
  0x27   :  { %14 = sbr.rel (!%p12_p8) target bundleno = 2 (0x2), region = 88 }

</bundles_post_ra>
